<compile_context>
chip_gen: v6e
topology: v6e:2x2x1
jax: 0.10.0
libtpu: 0.0.40
codegen_flags: <defaults>
</compile_context>

<pallas_src>
import functools

import jax
import jax.numpy as jnp
from jax.experimental import pallas as pl
from jax.experimental.pallas import tpu as pltpu


def _int_pow(x, n):
    """x**n for small non-negative integer n via repeated multiply (VPU)."""
    if n == 0:
        return jnp.ones_like(x)
    out = x
    for _ in range(n - 1):
        out = out * x
    return out


def _focal_loss_kernel(preds_ref, labels_ref, alpha_ref, out_ref, *, gamma, n_true):
    part = pl.program_id(0)       # partial-sum ("parallel") axis
    tile = pl.program_id(1)       # row-tile ("arbitrary") reduction axis
    tn, nc = preds_ref.shape

    @pl.when(tile == 0)
    def _():
        out_ref[0, 0] = jnp.float32(0.0)

    preds = preds_ref[...].astype(jnp.float32)     # (tn, C)
    labels = labels_ref[...]                       # (tn, 1) int32
    alpha = alpha_ref[...].astype(jnp.float32)     # (1, C)

    # Numerically-stable log-softmax along the class axis (lanes).
    m = jnp.max(preds, axis=1, keepdims=True)
    shifted = preds - m
    ex = jnp.exp(shifted)
    denom = jnp.sum(ex, axis=1, keepdims=True)
    logp = shifted - jnp.log(denom)

    # Mask selecting the label column of each valid (non-padded) row.
    class_ids = jax.lax.broadcasted_iota(jnp.int32, (tn, nc), 1)
    row_start = (part * pl.num_programs(1) + tile) * tn
    row_ids = row_start + jax.lax.broadcasted_iota(jnp.int32, (tn, nc), 0)
    mask = (class_ids == labels) & (row_ids < n_true)

    g = float(gamma)
    if g.is_integer() and 0 <= g <= 8:
        # Fully fused: one masked 2-D reduce; (1-p)^g via repeated multiply.
        p = ex * (1.0 / denom)                     # softmax, per-row reciprocal
        w = _int_pow(1.0 - p, int(g))
        contrib = jnp.where(mask, alpha * w * logp, 0.0)
        partial = -jnp.sum(contrib)
    else:
        # Non-integer gamma: gather per-row values; pow only on (tn, 1).
        logp_t = jnp.sum(jnp.where(mask, logp, 0.0), axis=1, keepdims=True)
        alpha_t = jnp.sum(jnp.where(mask, alpha, 0.0), axis=1, keepdims=True)
        p_t = jnp.exp(logp_t)                      # EUP, only tn elements
        w = jnp.power(jnp.maximum(1.0 - p_t, 0.0), g)
        partial = -jnp.sum(alpha_t * w * logp_t)   # padded rows: alpha_t == 0

    out_ref[0, 0] += partial


def focal_loss(preds, labels, alpha_vec, *, gamma=2.0, size_average=True,
               tile_n=512, num_partials=2):
    """preds: (N, C) float, labels: (N,) int, alpha_vec: (C,) float -> scalar f32."""
    preds2d = preds.reshape(-1, preds.shape[-1])
    n, c = preds2d.shape
    labels2d = labels.reshape(-1, 1).astype(jnp.int32)
    alpha2d = jnp.asarray(alpha_vec, jnp.float32).reshape(1, c)

    # Row tile: multiple of 8, no larger than needed for small N.
    tn = min(int(tile_n), ((n + 7) // 8) * 8)
    tn = max(8, ((tn + 7) // 8) * 8)

    num_tiles = -(-n // tn)
    num_partials = max(1, min(int(num_partials), num_tiles))
    tiles_per_part = -(-num_tiles // num_partials)
    n_pad = num_partials * tiles_per_part * tn
    if n_pad != n:
        preds2d = jnp.pad(preds2d, ((0, n_pad - n), (0, 0)))
        labels2d = jnp.pad(labels2d, ((0, n_pad - n), (0, 0)))

    kernel = functools.partial(_focal_loss_kernel, gamma=float(gamma), n_true=n)
    row_map = lambda p, i: (p * tiles_per_part + i, 0)

    cost = pl.CostEstimate(
        flops=12 * n_pad * c,
        transcendentals=n_pad * c + 2 * n_pad,
        bytes_accessed=4 * (n_pad * c + n_pad + c + num_partials),
    )

    partials = pl.pallas_call(
        kernel,
        out_shape=jax.ShapeDtypeStruct((num_partials, 1), jnp.float32),
        grid=(num_partials, tiles_per_part),
        in_specs=[
            pl.BlockSpec((tn, c), row_map),                  # preds  (row tiles)
            pl.BlockSpec((tn, 1), row_map),                  # labels (row tiles)
            pl.BlockSpec((1, c), lambda p, i: (0, 0)),       # alpha  (untiled)
        ],
        out_specs=pl.BlockSpec((1, 1), lambda p, i: (p, 0),
                               memory_space=pltpu.SMEM),     # per-partial scalar acc
        compiler_params=pltpu.CompilerParams(
            dimension_semantics=("parallel", "arbitrary"),
            vmem_limit_bytes=32 * 1024 * 1024,
        ),
        cost_estimate=cost,
    )(preds2d, labels2d, alpha2d)

    total = jnp.sum(partials)
    if size_average:
        return total / jnp.float32(n)
    return total


def _reference_focal_loss(preds, labels, alpha_vec, gamma=2.0, size_average=True):
    preds = preds.reshape(-1, preds.shape[-1]).astype(jnp.float32)
    logp = jax.nn.log_softmax(preds, axis=1)
    p = jnp.exp(logp)
    idx = labels.reshape(-1)
    p_t = p[jnp.arange(preds.shape[0]), idx]
    logp_t = logp[jnp.arange(preds.shape[0]), idx]
    a_t = alpha_vec[idx]
    loss = -a_t * (1.0 - p_t) ** gamma * logp_t
    return jnp.mean(loss) if size_average else jnp.sum(loss)


if __name__ == "__main__":
    num_classes = 53
    alpha_scalar = 0.25
    gamma = 2.0

    # alpha = [0.25, 0.75, 0.75, ...] mirroring the module __init__.
    alpha_vec = jnp.full((num_classes,), 1.0 - alpha_scalar, dtype=jnp.float32)
    alpha_vec = alpha_vec.at[0].set(alpha_scalar)

    key = jax.random.PRNGKey(0)
    k1, k2, k3, k4 = jax.random.split(key, 4)

    # Small case matching the module spec: preds (n, 53), labels (n,).
    n_small = 8
    preds_s = jax.random.normal(k1, (n_small, num_classes), dtype=jnp.float32)
    labels_s = jax.random.randint(k2, (n_small,), 0, num_classes, dtype=jnp.int32)

    out_s = focal_loss(preds_s, labels_s, alpha_vec, gamma=gamma, size_average=True)
    out_s = jax.block_until_ready(out_s)
    ref_s = _reference_focal_loss(preds_s, labels_s, alpha_vec, gamma=gamma,
                                  size_average=True)
    assert jnp.allclose(out_s, ref_s, rtol=1e-5, atol=1e-5), (out_s, ref_s)

    # Larger case exercising the row-tiled grid, tail-row masking and the
    # 2-way partial-sum split.
    n_big = 600
    preds_b = jax.random.normal(k3, (n_big, num_classes), dtype=jnp.float32)
    labels_b = jax.random.randint(k4, (n_big,), 0, num_classes, dtype=jnp.int32)

    out_b = focal_loss(preds_b, labels_b, alpha_vec, gamma=gamma,
                       size_average=True, tile_n=256, num_partials=2)
    out_b = jax.block_until_ready(out_b)
    ref_b = _reference_focal_loss(preds_b, labels_b, alpha_vec, gamma=gamma,
                                  size_average=True)
    assert jnp.allclose(out_b, ref_b, rtol=1e-5, atol=1e-5), (out_b, ref_b)

    # Non-integer gamma fallback path, sum reduction.
    out_g = focal_loss(preds_s, labels_s, alpha_vec, gamma=1.5, size_average=False)
    out_g = jax.block_until_ready(out_g)
    ref_g = _reference_focal_loss(preds_s, labels_s, alpha_vec, gamma=1.5,
                                  size_average=False)
    assert jnp.allclose(out_g, ref_g, rtol=1e-5, atol=1e-5), (out_g, ref_g)

    print("KERNEL_OK")
</pallas_src>

<mosaic_0001>
module attributes {stable_mosaic.version = 11 : i64} {
  func.func @_focal_loss_kernel(%arg0: i32, %arg1: i32, %arg2: memref<8x53xf32, #tpu.memory_space<vmem>>, %arg3: memref<8x1xi32, #tpu.memory_space<vmem>>, %arg4: memref<1x53xf32, #tpu.memory_space<vmem>>, %arg5: memref<1x1xf32, #tpu.memory_space<smem>>) attributes {dimension_semantics = [#tpu.dimension_semantics<parallel>, #tpu.dimension_semantics<arbitrary>], iteration_bounds = array<i64: 1, 1>, scalar_prefetch = 0 : i64, scratch_operands = 0 : i64, tpu.core_type = #tpu.core_type<tc>, window_params = [{transform_indices = @transform_0, window_bounds = array<i64: 8, 53>}, {transform_indices = @transform_1, window_bounds = array<i64: 8, 1>}, {pipeline_mode = #tpu.pipeline_mode<synchronous>, transform_indices = @transform_2, window_bounds = array<i64: 1, 53>}, {transform_indices = @transform_3, window_bounds = array<i64: 1, 1>}]} {
    %c0_i32 = arith.constant 0 : i32
    %0 = arith.cmpi eq, %arg1, %c0_i32 : i32
    %1 = arith.extui %0 : i1 to i32
    %c0_i32_0 = arith.constant 0 : i32
    %2 = arith.cmpi ne, %1, %c0_i32_0 : i32
    scf.if %2 {
      %cst_17 = arith.constant 0.000000e+00 : f32
      %c0_18 = arith.constant 0 : index
      %c0_19 = arith.constant 0 : index
      %48 = memref.load %arg5[%c0_18, %c0_19] : memref<1x1xf32, #tpu.memory_space<smem>>
      memref.store %cst_17, %arg5[%c0_18, %c0_19] : memref<1x1xf32, #tpu.memory_space<smem>>
    } else {
    }
    %c0 = arith.constant 0 : index
    %c0_1 = arith.constant 0 : index
    %3 = vector.load %arg2[%c0, %c0_1] : memref<8x53xf32, #tpu.memory_space<vmem>>, vector<8x53xf32>
    %c0_2 = arith.constant 0 : index
    %c0_3 = arith.constant 0 : index
    %4 = vector.load %arg3[%c0_2, %c0_3] : memref<8x1xi32, #tpu.memory_space<vmem>>, vector<8x1xi32>
    %c0_4 = arith.constant 0 : index
    %c0_5 = arith.constant 0 : index
    %5 = vector.load %arg4[%c0_4, %c0_5] : memref<1x53xf32, #tpu.memory_space<vmem>>, vector<1x53xf32>
    %cst = arith.constant dense<0xFF800000> : vector<8xf32>
    %6 = vector.multi_reduction <maximumf>, %3, %cst [1] : vector<8x53xf32> to vector<8xf32>
    %7 = vector.shape_cast %6 : vector<8xf32> to vector<8x1xf32>
    %8 = vector.broadcast %7 : vector<8x1xf32> to vector<8x53xf32>
    %9 = arith.subf %3, %8 : vector<8x53xf32>
    %10 = math.exp %9 : vector<8x53xf32>
    %cst_6 = arith.constant dense<0.000000e+00> : vector<8xf32>
    %11 = vector.multi_reduction <add>, %10, %cst_6 [1] : vector<8x53xf32> to vector<8xf32>
    %12 = vector.shape_cast %11 : vector<8xf32> to vector<8x1xf32>
    %13 = math.log %12 : vector<8x1xf32>
    %14 = vector.broadcast %13 : vector<8x1xf32> to vector<8x53xf32>
    %15 = arith.subf %9, %14 : vector<8x53xf32>
    %16 = tpu.iota {dimensions = array<i32: 1>} : vector<8x53xi32>
    %c1_i32 = arith.constant 1 : i32
    %17 = arith.muli %arg0, %c1_i32 : i32
    %18 = arith.addi %17, %arg1 : i32
    %c8_i32 = arith.constant 8 : i32
    %19 = arith.muli %18, %c8_i32 : i32
    %20 = tpu.iota {dimensions = array<i32: 0>} : vector<8x53xi32>
    %21 = vector.broadcast %19 : i32 to vector<8x53xi32>
    %22 = arith.addi %21, %20 : vector<8x53xi32>
    %23 = vector.broadcast %4 : vector<8x1xi32> to vector<8x53xi32>
    %24 = arith.cmpi eq, %16, %23 : vector<8x53xi32>
    %c8_i32_7 = arith.constant 8 : i32
    %25 = vector.broadcast %c8_i32_7 : i32 to vector<8x53xi32>
    %26 = arith.cmpi slt, %22, %25 : vector<8x53xi32>
    %27 = arith.andi %24, %26 : vector<8x53xi1>
    %cst_8 = arith.constant 1.000000e+00 : f32
    %28 = vector.broadcast %cst_8 : f32 to vector<8x1xf32>
    %29 = arith.divf %28, %12 : vector<8x1xf32>
    %30 = vector.broadcast %29 : vector<8x1xf32> to vector<8x53xf32>
    %31 = arith.mulf %10, %30 : vector<8x53xf32>
    %cst_9 = arith.constant 1.000000e+00 : f32
    %32 = vector.broadcast %cst_9 : f32 to vector<8x53xf32>
    %33 = arith.subf %32, %31 : vector<8x53xf32>
    %34 = arith.mulf %33, %33 : vector<8x53xf32>
    %35 = vector.broadcast %5 : vector<1x53xf32> to vector<8x53xf32>
    %36 = arith.mulf %35, %34 : vector<8x53xf32>
    %37 = arith.mulf %36, %15 : vector<8x53xf32>
    %cst_10 = arith.constant 0.000000e+00 : f32
    %38 = vector.broadcast %cst_10 : f32 to vector<8x53xf32>
    %39 = arith.select %27, %37, %38 : vector<8x53xi1>, vector<8x53xf32>
    %40 = vector.shape_cast %39 : vector<8x53xf32> to vector<1x8x53xf32>
    %cst_11 = arith.constant dense<0.000000e+00> : vector<1xf32>
    %41 = vector.multi_reduction <add>, %40, %cst_11 [1, 2] : vector<1x8x53xf32> to vector<1xf32>
    %42 = vector.shape_cast %41 : vector<1xf32> to vector<1x1x1xf32>
    %43 = vector.extract %42[0, 0, 0] : f32 from vector<1x1x1xf32>
    %cst_12 = arith.constant 0.000000e+00 : f32
    %44 = arith.subf %cst_12, %43 : f32
    %c0_13 = arith.constant 0 : index
    %c0_14 = arith.constant 0 : index
    %45 = memref.load %arg5[%c0_13, %c0_14] : memref<1x1xf32, #tpu.memory_space<smem>>
    %46 = arith.addf %45, %44 : f32
    %c0_15 = arith.constant 0 : index
    %c0_16 = arith.constant 0 : index
    %47 = memref.load %arg5[%c0_15, %c0_16] : memref<1x1xf32, #tpu.memory_space<smem>>
    memref.store %46, %arg5[%c0_15, %c0_16] : memref<1x1xf32, #tpu.memory_space<smem>>
    return
  }
  func.func @transform_0(%arg0: i32, %arg1: i32) -> (i32, i32) {
    %c1_i32 = arith.constant 1 : i32
    %0 = arith.muli %arg0, %c1_i32 : i32
    %1 = arith.addi %0, %arg1 : i32
    %c0_i32 = arith.constant 0 : i32
    %c0_i32_0 = arith.constant 0 : i32
    return %1, %c0_i32 : i32, i32
  }
  func.func @transform_1(%arg0: i32, %arg1: i32) -> (i32, i32) {
    %c1_i32 = arith.constant 1 : i32
    %0 = arith.muli %arg0, %c1_i32 : i32
    %1 = arith.addi %0, %arg1 : i32
    %c0_i32 = arith.constant 0 : i32
    %c0_i32_0 = arith.constant 0 : i32
    return %1, %c0_i32 : i32, i32
  }
  func.func @transform_2(%arg0: i32, %arg1: i32) -> (i32, i32) {
    %c0_i32 = arith.constant 0 : i32
    %c0_i32_0 = arith.constant 0 : i32
    %c0_i32_1 = arith.constant 0 : i32
    return %c0_i32, %c0_i32_0 : i32, i32
  }
  func.func @transform_3(%arg0: i32, %arg1: i32) -> (i32, i32) {
    %c0_i32 = arith.constant 0 : i32
    %c0_i32_0 = arith.constant 0 : i32
    return %arg0, %c0_i32 : i32, i32
  }
}

</mosaic_0001>

<bundles_post_ra>
// kernel: tpu_custom_call.1
= control target key start
LH: loop header
LB: loop body
LE: loop exit
PB: predicated region body
PF: predicated region fallthrough
CT: control target
= control target key end

     0   :  { %vm58_vm0 = vcmask 433152   ;;  %s200_s0 = inlined_call_operand.vmem [shape: f32[8,53], index: 0, kind: input, shape index: {}]   ;;  %s201_s1 = inlined_call_operand.vmem [shape: s32[8,1], index: 1, kind: input, shape index: {}]   ;;  %s202_s2 = inlined_call_operand.vmem [shape: f32[1,53], index: 2, kind: input, shape index: {}]   ;;  %s203_s3 = inlined_call_operand.hbm [shape: f32[1,1], index: 3, kind: output, shape index: {}]  }
   0x1   :  { %v55_v0 = vld [vmem:[%s200_s0] sm:$0xff] }
   0x2   :  { %8 = vsyncpa [#allocation3], 0  ;;  %v59_v1 = vsel %vm58_vm0, %v55_v0, -inf  ;;  %v56_v2 = vld [vmem:[%s201_s1] sm:$0xff]  ;;  %v163_v3 = vmov 0   ;;  %v71_v12 = vlaneseq  ;;  %s164_s17 = smov [#allocation2]  }
   0x3   :  { %60 = vmax.xlane.f32.xlu0 %v59_v1  ;;  %145 = vset.pattern.permute.xlu1 %v163_v3  ;;  %v139_v17 = vld [vmem:[%s202_s2] ss:$0 sm:$0xff] }
   0x4   :  { %146 = vset.pattern.permute.xlu0 %v163_v3  ;;  %80 = vperm.xlu1 %145, %v56_v2   ;;  %v72_v16 = vand.u32 127, %v71_v12 }
  0x7f   :  { %v81_v18 = vpop.permute.xlu1 %80 }
  0x80   :  { %vm82_vm1 = vcmp.eq.s32.totalorder %v72_v16, %v81_v18 }
  0x8c   :  { %v61_v4 = vpop.xlane.xlu0 %60 }
  0x8d   :  { %v62_v5 = vsub.f32 %v55_v0, %v61_v4 }
  0x8f   :  { %v63_v6 = vmul.f32 1.442695, %v62_v5 }
  0x91   :  { %147 = vpow2.f32 %v63_v6 }
  0x9e   :  { %v148_v7 = vpop.eup %147 }
  0x9f   :  { %v65_v8 = vsel %vm58_vm0, %v148_v7, 0.0 }
  0xa0   :  { %66 = vadd.xlane.f32.xlu0 %v65_v8 }
 0x129   :  { %v67_v9 = vpop.xlane.xlu0 %66 }
 0x12a   :  { %149 = vlog2.f32 %v67_v9 }
 0x12b   :  { %151 = vrcp.f32 %v67_v9 }
 0x137   :  { %v150_v10 = vpop.eup %149 }
 0x138   :  { %v152_v11 = vpop.eup %151  ;;  %v69_v14 = vmul.f32 0.6931472, %v150_v10 }
 0x139   :  { %v87_v13 = vmul.f32 %v152_v11, %v148_v7 }
 0x13a   :  { %v70_v20 = vsub.f32 %v62_v5, %v69_v14 }
 0x13b   :  { %v88_v15 = vsub.f32 1.0, %v87_v13 }
 0x13d   :  { %v89_v19 = vmul.f32 %v88_v15, %v88_v15 }
 0x13f   :  { %v96_v21 = vmul.f32 %v139_v17, %v89_v19 }
 0x141   :  { %v97_v22 = vmul.f32 %v96_v21, %v70_v20 }
 0x143   :  { %v98_v23 = vsel %vm82_vm1, %v97_v22, 0.0 }
 0x144   :  { %v99_v24 = vsel %vm58_vm0, %v98_v23, 0.0 }
 0x145   :  { %100 = vadd.xlane.f32.xlu1 %v99_v24 }
 0x1ce   :  { %v101_v25 = vpop.xlane.xlu1 %100 }
 0x1cf   :  { %v102_v26 = vrot.slane %v101_v25, 4 }
 0x1d1   :  { %v103_v27 = vadd.f32 %v102_v26, %v101_v25 }
 0x1d3   :  { %v104_v28 = vrot.slane %v103_v27, 2 }
 0x1d5   :  { %v105_v29 = vadd.f32 %v104_v28, %v103_v27 }
 0x1d7   :  { %v106_v30 = vrot.slane %v105_v29, 1 }
 0x1d9   :  { %v107_v31 = vadd.f32 %v106_v30, %v105_v29 }
 0x1db   :  { %140 = vpush %v107_v31 }
 0x20c   :  { %s141_s16 = spop %140 }
 0x20d   :  { %s109_s2 = ssub.f32 0.0, %s141_s16 }
 0x20f   :  { %113 = sst [smem:[#allocation2]] %s109_s2 }
 0x210   :  { %121 = dma.smem_to_hbm %s164_s17, 16, %s203_s3, [#allocation3]  }
 0x211   :  { %161 = dma.done.wait [#allocation3], 16  }
 0x212   :  { %162 = vsyncadd [#allocation3], 4294967280 }
 0x213   :  { %125 = sfence }
 0x214   :  { %126 = vsyncpa [#allocation3], 1 }

</bundles_post_ra>
